<compile_context>
chip_gen: v7x
topology: tpu7x:2x2x1
jax: 0.10.0
libtpu: 0.0.40
codegen_flags: <defaults>
</compile_context>

<pallas_src>
import functools

import jax
import jax.numpy as jnp
from jax.experimental import pallas as pl
from jax.experimental.pallas import tpu as pltpu


def _round_up(n, m):
    return ((n + m - 1) // m) * m


def _choose_batch_tile(batch):
    """Single tile for small batches; >=2 tiles for larger ones (dual-TC v7x); cap rows for VMEM."""
    if batch <= 128:
        return max(16, _round_up(batch, 16))
    return min(_round_up(-(-batch // 2), 16), 2048)


def _qnet_kernel(x_ref, w1_ref, b1_ref, w2_ref, b2_ref, w3_ref, b3_ref, o_ref):
    # Whole forward in one kernel: 3 MXU matmuls (f32 accumulate) + VPU activations.
    x = x_ref[...]                                                              # (tb, S) f32
    h1 = jnp.dot(x, w1_ref[...], preferred_element_type=jnp.float32) + b1_ref[...]
    h1 = jnp.maximum(h1, 0.0)                                                   # ReLU
    h2 = jnp.dot(h1, w2_ref[...], preferred_element_type=jnp.float32) + b2_ref[...]
    h2 = jnp.where(h2 > 0.0, h2, 0.01 * h2)                                     # LeakyReLU(0.01)
    q = jnp.dot(h2, w3_ref[...], preferred_element_type=jnp.float32) + b3_ref[...]
    o_ref[...] = q.astype(o_ref.dtype)                                          # (tb, A) store


@functools.partial(jax.jit, static_argnames=("batch_tile",))
def qnetwork_forward(x, params, batch_tile=None):
    """x: (B, state_size) f32. params: w1,b1,w2,b2,w3,b3; W stored as (in, out), b as (1, out)."""
    w1, b1 = params["w1"], params["b1"].reshape(1, -1)
    w2, b2 = params["w2"], params["b2"].reshape(1, -1)
    w3, b3 = params["w3"], params["b3"].reshape(1, -1)

    B, state_size = x.shape
    hidden = w1.shape[1]
    action_size = w3.shape[1]

    tb = batch_tile if batch_tile is not None else _choose_batch_tile(B)
    B_pad = _round_up(max(B, 1), tb)

    x_in = x.astype(jnp.float32)
    if B_pad != B:
        # Only wrapper-side op, and only when B is not a tile multiple; padded rows sliced off below.
        x_in = jnp.zeros((B_pad, state_size), jnp.float32).at[:B].set(x_in)

    full = lambda i: (0, 0)
    grid = (B_pad // tb,)

    flops = 2 * B_pad * (state_size * hidden + hidden * hidden + hidden * action_size)
    bytes_accessed = 4 * (x_in.size + w1.size + b1.size + w2.size + b2.size
                          + w3.size + b3.size + B_pad * action_size)

    out = pl.pallas_call(
        _qnet_kernel,
        out_shape=jax.ShapeDtypeStruct((B_pad, action_size), jnp.float32),
        grid_spec=pltpu.PrefetchScalarGridSpec(
            num_scalar_prefetch=0,
            grid=grid,
            in_specs=[
                pl.BlockSpec((tb, state_size), lambda i: (i, 0)),   # x tile (natural width)
                pl.BlockSpec((state_size, hidden), full),           # w1 (VMEM-resident, DMA'd once)
                pl.BlockSpec((1, hidden), full),                    # b1
                pl.BlockSpec((hidden, hidden), full),               # w2
                pl.BlockSpec((1, hidden), full),                    # b2
                pl.BlockSpec((hidden, action_size), full),          # w3 (natural width)
                pl.BlockSpec((1, action_size), full),               # b3
            ],
            out_specs=pl.BlockSpec((tb, action_size), lambda i: (i, 0)),
        ),
        compiler_params=pltpu.CompilerParams(
            dimension_semantics=("parallel",),
        ),
        cost_estimate=pl.CostEstimate(
            flops=flops, transcendentals=0, bytes_accessed=bytes_accessed),
    )(x_in, w1, b1, w2, b2, w3, b3)

    return out if B_pad == B else out[:B]


def init_qnetwork_params(key, state_size, action_size, hidden=256):
    """Deterministic init mimicking PyTorch Linear default (U(-1/sqrt(fan_in), +1/sqrt(fan_in)))."""
    keys = jax.random.split(key, 6)

    def linear(kw, kb, fan_in, fan_out):
        bound = 1.0 / jnp.sqrt(fan_in)
        w = jax.random.uniform(kw, (fan_in, fan_out), jnp.float32, -bound, bound)
        b = jax.random.uniform(kb, (1, fan_out), jnp.float32, -bound, bound)
        return w, b

    w1, b1 = linear(keys[0], keys[1], state_size, hidden)
    w2, b2 = linear(keys[2], keys[3], hidden, hidden)
    w3, b3 = linear(keys[4], keys[5], hidden, action_size)
    return {"w1": w1, "b1": b1, "w2": w2, "b2": b2, "w3": w3, "b3": b3}


def _reference_forward_f32(x, p):
    h1 = jnp.maximum(x @ p["w1"] + p["b1"], 0.0)
    h2pre = h1 @ p["w2"] + p["b2"]
    h2 = jnp.where(h2pre > 0.0, h2pre, 0.01 * h2pre)
    return h2 @ p["w3"] + p["b3"]


if __name__ == "__main__":
    key = jax.random.PRNGKey(0)
    k_param, k_x, k_x2 = jax.random.split(key, 3)

    state_size, action_size = 8, 4
    params = init_qnetwork_params(k_param, state_size, action_size, hidden=256)

    # Replay-buffer style batch (tile multiple -> zero wrapper-side padding ops).
    x = jax.random.normal(k_x, (32, state_size), jnp.float32)
    q = jax.block_until_ready(qnetwork_forward(x, params))
    assert q.shape == (32, action_size)
    q_ref = _reference_forward_f32(x, params)
    assert jnp.allclose(q, q_ref, atol=2e-2, rtol=2e-2), "mismatch vs f32 reference (batch=32)"

    # act()-style small ragged batch (exercises the batch-pad + slice path).
    x_small = jax.random.normal(k_x2, (7, state_size), jnp.float32)
    q_small = jax.block_until_ready(qnetwork_forward(x_small, params))
    assert q_small.shape == (7, action_size)
    q_small_ref = _reference_forward_f32(x_small, params)
    assert jnp.allclose(q_small, q_small_ref, atol=2e-2, rtol=2e-2), "mismatch vs f32 reference (batch=7)"

    print("KERNEL_OK")
</pallas_src>

<mosaic_0001>
module attributes {stable_mosaic.version = 11 : i64} {
  func.func @_qnet_kernel(%arg0: i32, %arg1: memref<32x8xf32, #tpu.memory_space<vmem>>, %arg2: memref<8x256xf32, #tpu.memory_space<vmem>>, %arg3: memref<1x256xf32, #tpu.memory_space<vmem>>, %arg4: memref<256x256xf32, #tpu.memory_space<vmem>>, %arg5: memref<1x256xf32, #tpu.memory_space<vmem>>, %arg6: memref<256x4xf32, #tpu.memory_space<vmem>>, %arg7: memref<1x4xf32, #tpu.memory_space<vmem>>, %arg8: memref<32x4xf32, #tpu.memory_space<vmem>>) attributes {dimension_semantics = [#tpu.dimension_semantics<parallel>], iteration_bounds = array<i64: 1>, scalar_prefetch = 0 : i64, scratch_operands = 0 : i64, tpu.core_type = #tpu.core_type<tc>, window_params = [{transform_indices = @transform_0, window_bounds = array<i64: 32, 8>}, {pipeline_mode = #tpu.pipeline_mode<synchronous>, transform_indices = @transform_1, window_bounds = array<i64: 8, 256>}, {pipeline_mode = #tpu.pipeline_mode<synchronous>, transform_indices = @transform_2, window_bounds = array<i64: 1, 256>}, {pipeline_mode = #tpu.pipeline_mode<synchronous>, transform_indices = @transform_3, window_bounds = array<i64: 256, 256>}, {pipeline_mode = #tpu.pipeline_mode<synchronous>, transform_indices = @transform_4, window_bounds = array<i64: 1, 256>}, {pipeline_mode = #tpu.pipeline_mode<synchronous>, transform_indices = @transform_5, window_bounds = array<i64: 256, 4>}, {pipeline_mode = #tpu.pipeline_mode<synchronous>, transform_indices = @transform_6, window_bounds = array<i64: 1, 4>}, {transform_indices = @transform_7, window_bounds = array<i64: 32, 4>}]} {
    %c0 = arith.constant 0 : index
    %c0_0 = arith.constant 0 : index
    %0 = vector.load %arg1[%c0, %c0_0] : memref<32x8xf32, #tpu.memory_space<vmem>>, vector<32x8xf32>
    %c0_1 = arith.constant 0 : index
    %c0_2 = arith.constant 0 : index
    %1 = vector.load %arg2[%c0_1, %c0_2] : memref<8x256xf32, #tpu.memory_space<vmem>>, vector<8x256xf32>
    %cst = arith.constant dense<0.000000e+00> : vector<32x256xf32>
    %2 = tpu.matmul %0, %1, %cst {dimension_numbers = #tpu.dot_dimension_numbers<[1], [0], [0], [1], [0, 0, 1, 1], [], []>} : vector<32x8xf32>, vector<8x256xf32>, vector<32x256xf32> -> vector<32x256xf32>
    %c0_3 = arith.constant 0 : index
    %c0_4 = arith.constant 0 : index
    %3 = vector.load %arg3[%c0_3, %c0_4] : memref<1x256xf32, #tpu.memory_space<vmem>>, vector<1x256xf32>
    %4 = vector.broadcast %3 : vector<1x256xf32> to vector<32x256xf32>
    %5 = arith.addf %2, %4 : vector<32x256xf32>
    %cst_5 = arith.constant 0.000000e+00 : f32
    %6 = vector.broadcast %cst_5 : f32 to vector<32x256xf32>
    %7 = arith.maximumf %5, %6 : vector<32x256xf32>
    %c0_6 = arith.constant 0 : index
    %c0_7 = arith.constant 0 : index
    %8 = vector.load %arg4[%c0_6, %c0_7] : memref<256x256xf32, #tpu.memory_space<vmem>>, vector<256x256xf32>
    %cst_8 = arith.constant dense<0.000000e+00> : vector<32x256xf32>
    %9 = tpu.matmul %7, %8, %cst_8 {dimension_numbers = #tpu.dot_dimension_numbers<[1], [0], [0], [1], [0, 0, 1, 1], [], []>} : vector<32x256xf32>, vector<256x256xf32>, vector<32x256xf32> -> vector<32x256xf32>
    %c0_9 = arith.constant 0 : index
    %c0_10 = arith.constant 0 : index
    %10 = vector.load %arg5[%c0_9, %c0_10] : memref<1x256xf32, #tpu.memory_space<vmem>>, vector<1x256xf32>
    %11 = vector.broadcast %10 : vector<1x256xf32> to vector<32x256xf32>
    %12 = arith.addf %9, %11 : vector<32x256xf32>
    %cst_11 = arith.constant 0.000000e+00 : f32
    %13 = vector.broadcast %cst_11 : f32 to vector<32x256xf32>
    %14 = arith.cmpf ogt, %12, %13 : vector<32x256xf32>
    %cst_12 = arith.constant 0.00999999977 : f32
    %15 = vector.broadcast %cst_12 : f32 to vector<32x256xf32>
    %16 = arith.mulf %15, %12 : vector<32x256xf32>
    %17 = arith.select %14, %12, %16 : vector<32x256xi1>, vector<32x256xf32>
    %c0_13 = arith.constant 0 : index
    %c0_14 = arith.constant 0 : index
    %18 = vector.load %arg6[%c0_13, %c0_14] : memref<256x4xf32, #tpu.memory_space<vmem>>, vector<256x4xf32>
    %cst_15 = arith.constant dense<0.000000e+00> : vector<32x4xf32>
    %19 = tpu.matmul %17, %18, %cst_15 {dimension_numbers = #tpu.dot_dimension_numbers<[1], [0], [0], [1], [0, 0, 1, 1], [], []>} : vector<32x256xf32>, vector<256x4xf32>, vector<32x4xf32> -> vector<32x4xf32>
    %c0_16 = arith.constant 0 : index
    %c0_17 = arith.constant 0 : index
    %20 = vector.load %arg7[%c0_16, %c0_17] : memref<1x4xf32, #tpu.memory_space<vmem>>, vector<1x4xf32>
    %21 = vector.broadcast %20 : vector<1x4xf32> to vector<32x4xf32>
    %22 = arith.addf %19, %21 : vector<32x4xf32>
    %c0_18 = arith.constant 0 : index
    %c0_19 = arith.constant 0 : index
    %23 = vector.load %arg8[%c0_18, %c0_19] : memref<32x4xf32, #tpu.memory_space<vmem>>, vector<32x4xf32>
    tpu.vector_store %arg8[%c0_18, %c0_19], %22 {strides = array<i32>} : memref<32x4xf32, #tpu.memory_space<vmem>>, vector<32x4xf32>,
    return
  }
  func.func @transform_0(%arg0: i32) -> (i32, i32) {
    %c0_i32 = arith.constant 0 : i32
    %c0_i32_0 = arith.constant 0 : i32
    return %arg0, %c0_i32 : i32, i32
  }
  func.func @transform_1(%arg0: i32) -> (i32, i32) {
    %c0_i32 = arith.constant 0 : i32
    %c0_i32_0 = arith.constant 0 : i32
    %c0_i32_1 = arith.constant 0 : i32
    return %c0_i32, %c0_i32_0 : i32, i32
  }
  func.func @transform_2(%arg0: i32) -> (i32, i32) {
    %c0_i32 = arith.constant 0 : i32
    %c0_i32_0 = arith.constant 0 : i32
    %c0_i32_1 = arith.constant 0 : i32
    return %c0_i32, %c0_i32_0 : i32, i32
  }
  func.func @transform_3(%arg0: i32) -> (i32, i32) {
    %c0_i32 = arith.constant 0 : i32
    %c0_i32_0 = arith.constant 0 : i32
    %c0_i32_1 = arith.constant 0 : i32
    return %c0_i32, %c0_i32_0 : i32, i32
  }
  func.func @transform_4(%arg0: i32) -> (i32, i32) {
    %c0_i32 = arith.constant 0 : i32
    %c0_i32_0 = arith.constant 0 : i32
    %c0_i32_1 = arith.constant 0 : i32
    return %c0_i32, %c0_i32_0 : i32, i32
  }
  func.func @transform_5(%arg0: i32) -> (i32, i32) {
    %c0_i32 = arith.constant 0 : i32
    %c0_i32_0 = arith.constant 0 : i32
    %c0_i32_1 = arith.constant 0 : i32
    return %c0_i32, %c0_i32_0 : i32, i32
  }
  func.func @transform_6(%arg0: i32) -> (i32, i32) {
    %c0_i32 = arith.constant 0 : i32
    %c0_i32_0 = arith.constant 0 : i32
    %c0_i32_1 = arith.constant 0 : i32
    return %c0_i32, %c0_i32_0 : i32, i32
  }
  func.func @transform_7(%arg0: i32) -> (i32, i32) {
    %c0_i32 = arith.constant 0 : i32
    %c0_i32_0 = arith.constant 0 : i32
    return %arg0, %c0_i32 : i32, i32
  }
}

</mosaic_0001>

<bundles_post_ra>
// kernel: qnetwork_forward.1
= control target key start
LH: loop header
LB: loop body
LE: loop exit
PB: predicated region body
PF: predicated region fallthrough
CT: control target
= control target key end

     0   :  { %12 = vsyncpa [#allocation3], 0  ;;  %s664_s24 = smov [#allocation2]   ;;  %s863_s0 = inlined_call_operand.vmem [shape: f32[32,8], index: 0, kind: input, shape index: {}]   ;;  %s864_s1 = inlined_call_operand.vmem [shape: f32[8,256], index: 1, kind: input, shape index: {}]   ;;  %s865_s2 = inlined_call_operand.vmem [shape: f32[1,256], index: 2, kind: input, shape index: {}]   ;;  %s866_s3 = inlined_call_operand.hbm [shape: f32[256,256], index: 3, kind: input, shape index: {}]   ;;  %s867_s4 = inlined_call_operand.vmem [shape: f32[1,256], index: 4, kind: input, shape index: {}]   ;;  %s868_s5 = inlined_call_operand.vmem [shape: f32[256,4], index: 5, kind: input, shape index: {}]   ;;  %s869_s6 = inlined_call_operand.vmem [shape: f32[1,4], index: 6, kind: input, shape index: {}]   ;;  %s870_s7 = inlined_call_operand.vmem [shape: f32[32,4], index: 7, kind: output, shape index: {}]  }
   0x1   :  { %s24_s25 = sshll.u32 %s664_s24, 4  ;;  %s640_s28 = scalar_lea.hbm %s866_s3, 8192  ;;  %s25_s25 = int_to_ptr.vmem [resolvable:$true] %s24_s25 }
   0x2   :  { %p641_p0 = scmp.ne.s32.totalorder %s866_s3, %s640_s28  ;;  %p644_p1 = scmp.lt.u32.totalorder %s640_s28, %s866_s3 }
   0x4   :  { %p646_p2 = pnand %p644_p1, %p641_p0 }
   0x6   :  { %649 = shalt.err (!%p646_p2)
}
   0x7   :  { %s650_s10 = scalar_lea.vmem %s25_s25, 8192  ;;  %p655_p4 = scmp.lt.s32.totalorder %s25_s25, %s25_s25 }
   0x8   :  { %p651_p3 = scmp.ne.s32.totalorder %s25_s25, %s650_s10  ;;  %p656_p5 = scmp.lt.s32.totalorder %s650_s10, %s650_s10 }
   0xa   :  { %p657_p6 = por %p656_p5, %p655_p4 }
   0xc   :  { %p658_p7 = pnand %p657_p6, %p651_p3 }
   0xe   :  { %661 = shalt.err (!%p658_p7)
}
   0xf   :  { %s665_s11 = smov 256   ;;  %s666_s12 = smov 16  }
  0x10   :  { %30 = dma.hbm_to_vmem [thread:$0]  %s866_s3, 8192, %s25_s25, [#allocation3], %s665_s11, %s665_s11, %s666_s12  }
  0x11   :  { %662 = dma.done.wait [#allocation3], 8192  }
  0x12   :  { %663 = vsyncadd [#allocation3], 4294959104  ;;  %v667_v0 = vmov 0.0   ;;  %v45_v1 = vld [vmem:[%s864_s1 + $0x8] sm:$0xff]  ;;  %v44_v2 = vld [vmem:[%s864_s1] sm:$0xff]  ;;  %vm58_vm0 = vcmask 64512  }
  0x13   :  { %135 = vmatprep.mubr.f32.mxu0 %v667_v0  ;;  %v40_v3 = vld [vmem:[%s863_s0] sm:$0xff]  ;;  %71 = vmatprep.subr.mxu0 %v45_v1  ;;  %v41_v4 = vld [vmem:[%s863_s0 + $0x8] sm:$0xff]  ;;  %v171_v6 = vld [vmem:[#allocation2 + $0x18] sm:$0xff]  ;;  %vm481_vm9 = vcmask 31744  }
  0x14   :  { %72 = vmatpush1.msra.mxu0 %v44_v2  ;;  %v169_v5 = vld [vmem:[#allocation2 + $0x8] sm:$0xff]  ;;  %v168_v7 = vld [vmem:[#allocation2] sm:$0xff]  ;;  %v170_v9 = vld [vmem:[#allocation2 + $0x10] sm:$0xff] }
  0x15   :  { %491 = vmatmul.mubr.msk.f32.vlgmr.msra.gmra.mrb[0].mxu0 %vm58_vm0, %v40_v3  ;;  %v540_v8 = vpack.c.bf16 %v171_v6, %v169_v5  ;;  %v173_v10 = vld [vmem:[#allocation2 + $0x28] sm:$0xff]  ;;  %v175_v11 = vld [vmem:[#allocation2 + $0x38] sm:$0xff]  ;;  %v542_v12 = vpack.c.bf16 %v170_v9, %v168_v7  ;;  %v172_v14 = vld [vmem:[#allocation2 + $0x20] sm:$0xff] }
  0x16   :  { %141 = vmatprep.mubr.f32.mxu0 %v667_v0  ;;  %v544_v13 = vpack.c.bf16 %v175_v11, %v173_v10  ;;  %v174_v15 = vld [vmem:[#allocation2 + $0x30] sm:$0xff]  ;;  %v177_v16 = vld [vmem:[#allocation2 + $0x48] sm:$0xff]  ;;  %v179_v17 = vld [vmem:[#allocation2 + $0x58] sm:$0xff] }
  0x17   :  { %541 = vmatprep.subr.bf16.mxu1 %v540_v8  ;;  %v546_v18 = vpack.c.bf16 %v174_v15, %v172_v14  ;;  %v548_v19 = vpack.c.bf16 %v179_v17, %v177_v16  ;;  %v176_v20 = vld [vmem:[#allocation2 + $0x40] sm:$0xff]  ;;  %v178_v21 = vld [vmem:[#allocation2 + $0x50] sm:$0xff]  ;;  %v181_v23 = vld [vmem:[#allocation2 + $0x68] sm:$0xff] }
  0x18   :  { %543 = vmatpush1.bf16.msra.mxu1 %v542_v12  ;;  %v42_v22 = vld [vmem:[%s863_s0 + $0x10] sm:$0xff]  ;;  %v183_v24 = vld [vmem:[#allocation2 + $0x78] sm:$0xff]  ;;  %v550_v25 = vpack.c.bf16 %v178_v21, %v176_v20  ;;  %v180_v27 = vld [vmem:[#allocation2 + $0x60] sm:$0xff] }
  0x19   :  { %492 = vmatmul.mubr.msk.f32.gmra.mrb[2].mxu0 %vm58_vm0, %v41_v4  ;;  %545 = vmatprep.subr.bf16.mxu1 %v544_v13  ;;  %v552_v26 = vpack.c.bf16 %v183_v24, %v181_v23  ;;  %v182_v28 = vld [vmem:[#allocation2 + $0x70] sm:$0xff]  ;;  %v43_v29 = vld [vmem:[%s863_s0 + $0x18] sm:$0xff]  ;;  %v185_v30 = vld [vmem:[#allocation2 + $0x88] sm:$0xff] }
  0x1a   :  { %147 = vmatprep.mubr.f32.mxu0 %v667_v0  ;;  %v187_v31 = vld [vmem:[#allocation2 + $0x98] sm:$0xff]  ;;  %v554_v32 = vpack.c.bf16 %v182_v28, %v180_v27  ;;  %v184_v34 = vld [vmem:[#allocation2 + $0x80] sm:$0xff]  ;;  %v186_v35 = vld [vmem:[#allocation2 + $0x90] sm:$0xff] }
  0x1b   :  { %v556_v33 = vpack.c.bf16 %v187_v31, %v185_v30  ;;  %v189_v36 = vld [vmem:[#allocation2 + $0xa8] sm:$0xff]  ;;  %v191_v37 = vld [vmem:[#allocation2 + $0xb8] sm:$0xff]  ;;  %v558_v38 = vpack.c.bf16 %v186_v35, %v184_v34  ;;  %v188_v40 = vld [vmem:[#allocation2 + $0xa0] sm:$0xff] }
  0x1c   :  { %547 = vmatpush1.bf16.msra.mxu1 %v546_v18  ;;  %v560_v39 = vpack.c.bf16 %v191_v37, %v189_v36  ;;  %v190_v41 = vld [vmem:[#allocation2 + $0xb0] sm:$0xff]  ;;  %v193_v42 = vld [vmem:[#allocation2 + $0xc8] sm:$0xff]  ;;  %v195_v43 = vld [vmem:[#allocation2 + $0xd8] sm:$0xff] }
  0x1d   :  { %493 = vmatmul.mubr.msk.f32.gmra.mrb[4].mxu0 %vm58_vm0, %v42_v22  ;;  %549 = vmatprep.subr.bf16.mxu1 %v548_v19  ;;  %v562_v44 = vpack.c.bf16 %v190_v41, %v188_v40  ;;  %v564_v45 = vpack.c.bf16 %v195_v43, %v193_v42  ;;  %v192_v46 = vld [vmem:[#allocation2 + $0xc0] sm:$0xff]  ;;  %v194_v47 = vld [vmem:[#allocation2 + $0xd0] sm:$0xff]  ;;  %v197_v48 = vld [vmem:[#allocation2 + $0xe8] sm:$0xff] }
  0x1e   :  { %153 = vmatprep.mubr.f32.mxu0 %v667_v0  ;;  %v199_v49 = vld [vmem:[#allocation2 + $0xf8] sm:$0xff]  ;;  %v566_v50 = vpack.c.bf16 %v194_v47, %v192_v46  ;;  %v196_v52 = vld [vmem:[#allocation2 + $0xe0] sm:$0xff]  ;;  %v198_v53 = vld [vmem:[#allocation2 + $0xf0] sm:$0xff] }
  0x1f   :  { %v568_v51 = vpack.c.bf16 %v199_v49, %v197_v48  ;;  %v201_v54 = vld [vmem:[#allocation2 + $0x108] sm:$0xff]  ;;  %v203_v55 = vld [vmem:[#allocation2 + $0x118] sm:$0xff]  ;;  %v570_v56 = vpack.c.bf16 %v198_v53, %v196_v52  ;;  %v200_v58 = vld [vmem:[#allocation2 + $0x100] sm:$0xff] }
  0x20   :  { %551 = vmatpush1.bf16.msra.mxu1 %v550_v25  ;;  %v572_v57 = vpack.c.bf16 %v203_v55, %v201_v54  ;;  %v202_v59 = vld [vmem:[#allocation2 + $0x110] sm:$0xff]  ;;  %v205_v60 = vld [vmem:[#allocation2 + $0x128] sm:$0xff]  ;;  %v207_v61 = vld [vmem:[#allocation2 + $0x138] sm:$0xff] }
  0x21   :  { %494 = vmatmul.mubr.msk.f32.gmra.mrb[6].mxu0 %vm58_vm0, %v43_v29  ;;  %553 = vmatprep.subr.bf16.mxu1 %v552_v26  ;;  %v574_v62 = vpack.c.bf16 %v202_v59, %v200_v58  ;;  %v576_v63 = vpack.c.bf16 %v207_v61, %v205_v60  ;;  %v204_v0 = vld [vmem:[#allocation2 + $0x120] sm:$0xff]  ;;  %v206_v1 = vld [vmem:[#allocation2 + $0x130] sm:$0xff]  ;;  %v209_v2 = vld [vmem:[#allocation2 + $0x148] sm:$0xff] }
  0x22   :  { %v211_v3 = vld [vmem:[#allocation2 + $0x158] sm:$0xff]  ;;  %v578_v4 = vpack.c.bf16 %v206_v1, %v204_v0  ;;  %v208_v6 = vld [vmem:[#allocation2 + $0x140] sm:$0xff]  ;;  %v210_v7 = vld [vmem:[#allocation2 + $0x150] sm:$0xff] }
  0x23   :  { %v580_v5 = vpack.c.bf16 %v211_v3, %v209_v2  ;;  %v213_v8 = vld [vmem:[#allocation2 + $0x168] sm:$0xff]  ;;  %v215_v9 = vld [vmem:[#allocation2 + $0x178] sm:$0xff]  ;;  %v582_v10 = vpack.c.bf16 %v210_v7, %v208_v6  ;;  %v212_v12 = vld [vmem:[#allocation2 + $0x160] sm:$0xff] }
  0x24   :  { %555 = vmatpush1.bf16.msra.mxu1 %v554_v32  ;;  %v584_v11 = vpack.c.bf16 %v215_v9, %v213_v8  ;;  %v214_v13 = vld [vmem:[#allocation2 + $0x170] sm:$0xff]  ;;  %v217_v14 = vld [vmem:[#allocation2 + $0x188] sm:$0xff]  ;;  %v219_v15 = vld [vmem:[#allocation2 + $0x198] sm:$0xff] }
  0x25   :  { %557 = vmatprep.subr.bf16.mxu1 %v556_v33  ;;  %v586_v16 = vpack.c.bf16 %v214_v13, %v212_v12  ;;  %v588_v17 = vpack.c.bf16 %v219_v15, %v217_v14  ;;  %v216_v18 = vld [vmem:[#allocation2 + $0x180] sm:$0xff]  ;;  %v218_v19 = vld [vmem:[#allocation2 + $0x190] sm:$0xff]  ;;  %v221_v20 = vld [vmem:[#allocation2 + $0x1a8] sm:$0xff] }
  0x26   :  { %v223_v21 = vld [vmem:[#allocation2 + $0x1b8] sm:$0xff]  ;;  %v590_v22 = vpack.c.bf16 %v218_v19, %v216_v18  ;;  %v220_v24 = vld [vmem:[#allocation2 + $0x1a0] sm:$0xff]  ;;  %v222_v25 = vld [vmem:[#allocation2 + $0x1b0] sm:$0xff] }
  0x27   :  { %v592_v23 = vpack.c.bf16 %v223_v21, %v221_v20  ;;  %v225_v26 = vld [vmem:[#allocation2 + $0x1c8] sm:$0xff]  ;;  %v227_v27 = vld [vmem:[#allocation2 + $0x1d8] sm:$0xff]  ;;  %v594_v28 = vpack.c.bf16 %v222_v25, %v220_v24  ;;  %v224_v30 = vld [vmem:[#allocation2 + $0x1c0] sm:$0xff] }
  0x28   :  { %559 = vmatpush1.bf16.msra.mxu1 %v558_v38  ;;  %v596_v29 = vpack.c.bf16 %v227_v27, %v225_v26  ;;  %v226_v31 = vld [vmem:[#allocation2 + $0x1d0] sm:$0xff]  ;;  %v229_v33 = vld [vmem:[#allocation2 + $0x1e8] sm:$0xff]  ;;  %v231_v34 = vld [vmem:[#allocation2 + $0x1f8] sm:$0xff] }
  0x29   :  { %561 = vmatprep.subr.bf16.mxu1 %v560_v39  ;;  %v598_v32 = vpack.c.bf16 %v226_v31, %v224_v30  ;;  %v600_v35 = vpack.c.bf16 %v231_v34, %v229_v33  ;;  %v228_v36 = vld [vmem:[#allocation2 + $0x1e0] sm:$0xff]  ;;  %v230_v37 = vld [vmem:[#allocation2 + $0x1f0] sm:$0xff]  ;;  %v374_v40 = vld [vmem:[%s868_s5 + $0x88] sm:$0xff] }
  0x2a   :  { %v602_v38 = vpack.c.bf16 %v230_v37, %v228_v36  ;;  %v373_v39 = vld [vmem:[%s868_s5 + $0x80] sm:$0xff]  ;;  %v358_v43 = vld [vmem:[%s868_s5 + $0x8] sm:$0xff]  ;;  %v359_v48 = vld [vmem:[%s868_s5 + $0x10] sm:$0xff] }
  0x2b   :  { %v357_v41 = vld [vmem:[%s868_s5] sm:$0xff]  ;;  %v604_v42 = vpack.c.bf16 %v374_v40, %v373_v39  ;;  %v360_v49 = vld [vmem:[%s868_s5 + $0x18] sm:$0xff]  ;;  %v362_v55 = vld [vmem:[%s868_s5 + $0x28] sm:$0xff] }
  0x2c   :  { %563 = vmatpush1.bf16.msra.mxu1 %v562_v44  ;;  %v375_v44 = vld [vmem:[%s868_s5 + $0x90] sm:$0xff]  ;;  %v606_v46 = vpack.c.bf16 %v358_v43, %v357_v41  ;;  %v610_v52 = vpack.c.bf16 %v360_v49, %v359_v48  ;;  %v361_v54 = vld [vmem:[%s868_s5 + $0x20] sm:$0xff]  ;;  %v364_v61 = vld [vmem:[%s868_s5 + $0x38] sm:$0xff] }
  0x2d   :  { %565 = vmatprep.subr.bf16.mxu1 %v564_v45  ;;  %v376_v45 = vld [vmem:[%s868_s5 + $0x98] sm:$0xff]  ;;  %605 = vmatprep.subr.bf16.mxu0 %v604_v42  ;;  %v614_v58 = vpack.c.bf16 %v362_v55, %v361_v54  ;;  %v363_v60 = vld [vmem:[%s868_s5 + $0x30] sm:$0xff]  ;;  %v365_v2 = vld [vmem:[%s868_s5 + $0x40] sm:$0xff] }
  0x2e   :  { %v608_v47 = vpack.c.bf16 %v376_v45, %v375_v44  ;;  %607 = vmatpush3.bf16.msra.mxu0 %v606_v46  ;;  %v618_v0 = vpack.c.bf16 %v364_v61, %v363_v60  ;;  %v366_v3 = vld [vmem:[%s868_s5 + $0x48] sm:$0xff]  ;;  %v367_v8 = vld [vmem:[%s868_s5 + $0x50] sm:$0xff]  ;;  %v368_v9 = vld [vmem:[%s868_s5 + $0x58] sm:$0xff] }
  0x2f   :  { %v622_v6 = vpack.c.bf16 %v366_v3, %v365_v2  ;;  %v46_v14 = vld [vmem:[%s865_s2] sm:$0x3]  ;;  %v386_v43 = vld [vmem:[%s868_s5 + $0xe8] sm:$0xff]  ;;  %v387_v48 = vld [vmem:[%s868_s5 + $0xf0] sm:$0xff] }
  0x30   :  { %567 = vmatpush1.bf16.msra.mxu1 %v566_v50  ;;  %v377_v50 = vld [vmem:[%s868_s5 + $0xa0] sm:$0xff]  ;;  %609 = vmatprep.subr.bf16.mxu0 %v608_v47  ;;  %v370_v46 = vld [vmem:[%s868_s5 + $0x68] sm:$0xff]  ;;  %v388_v49 = vld [vmem:[%s868_s5 + $0xf8] sm:$0xff] }
  0x31   :  { %569 = vmatprep.subr.bf16.mxu1 %v568_v51  ;;  %v378_v51 = vld [vmem:[%s868_s5 + $0xa8] sm:$0xff]  ;;  %v385_v42 = vld [vmem:[%s868_s5 + $0xe0] sm:$0xff] }
  0x32   :  { %v612_v53 = vpack.c.bf16 %v378_v51, %v377_v50  ;;  %611 = vmatpush3.bf16.msra.mxu0 %v610_v52  ;;  %v628_v44 = vpack.c.bf16 %v386_v43, %v385_v42  ;;  %v369_v45 = vld [vmem:[%s868_s5 + $0x60] sm:$0xff]  ;;  %v632_v50 = vpack.c.bf16 %v388_v49, %v387_v48  ;;  %v371_v51 = vld [vmem:[%s868_s5 + $0x70] sm:$0xff]  ;;  %v372_v52 = vld [vmem:[%s868_s5 + $0x78] sm:$0xff] }
  0x33   :  { %v630_v47 = vpack.c.bf16 %v370_v46, %v369_v45  ;;  %v232_v54 = vld [vmem:[%s867_s4] sm:$0x3] }
  0x34   :  { %571 = vmatpush1.bf16.msra.mxu1 %v570_v56  ;;  %v379_v56 = vld [vmem:[%s868_s5 + $0xb0] sm:$0xff]  ;;  %613 = vmatprep.subr.bf16.mxu0 %v612_v53  ;;  %v634_v53 = vpack.c.bf16 %v372_v52, %v371_v51 }
  0x35   :  { %573 = vmatprep.subr.bf16.mxu1 %v572_v57  ;;  %v380_v57 = vld [vmem:[%s868_s5 + $0xb8] sm:$0xff] }
  0x36   :  { %v616_v59 = vpack.c.bf16 %v380_v57, %v379_v56  ;;  %615 = vmatpush3.bf16.msra.mxu0 %v614_v58 }
  0x38   :  { %575 = vmatpush1.bf16.msra.mxu1 %v574_v62  ;;  %v381_v62 = vld [vmem:[%s868_s5 + $0xc0] sm:$0xff]  ;;  %617 = vmatprep.subr.bf16.mxu0 %v616_v59 }
  0x39   :  { %577 = vmatprep.subr.bf16.mxu1 %v576_v63  ;;  %v382_v63 = vld [vmem:[%s868_s5 + $0xc8] sm:$0xff] }
  0x3a   :  { %v620_v1 = vpack.c.bf16 %v382_v63, %v381_v62  ;;  %619 = vmatpush3.bf16.msra.mxu0 %v618_v0 }
  0x3c   :  { %579 = vmatpush1.bf16.msra.mxu1 %v578_v4  ;;  %v383_v4 = vld [vmem:[%s868_s5 + $0xd0] sm:$0xff]  ;;  %621 = vmatprep.subr.bf16.mxu0 %v620_v1 }
  0x3d   :  { %581 = vmatprep.subr.bf16.mxu1 %v580_v5  ;;  %v384_v5 = vld [vmem:[%s868_s5 + $0xd8] sm:$0xff] }
  0x3e   :  { %v624_v7 = vpack.c.bf16 %v384_v5, %v383_v4  ;;  %623 = vmatpush3.bf16.msra.mxu0 %v622_v6 }
  0x40   :  { %583 = vmatpush1.bf16.msra.mxu1 %v582_v10  ;;  %v626_v10 = vpack.c.bf16 %v368_v9, %v367_v8  ;;  %625 = vmatprep.subr.bf16.mxu0 %v624_v7 }
  0x41   :  { %585 = vmatprep.subr.bf16.mxu1 %v584_v11  ;;  %v48_v11 = vlaneseq }
  0x42   :  { %627 = vmatpush3.bf16.msra.mxu0 %v626_v10 }
  0x43   :  { %v49_v12 = vshrl.u32 %v48_v11, 7  ;;  %629 = vmatprep.subr.bf16.mxu0 %v628_v44 }
  0x44   :  { %587 = vmatpush1.bf16.msra.mxu1 %v586_v16 }
  0x45   :  { %589 = vmatprep.subr.bf16.mxu1 %v588_v17  ;;  %v50_v13 = vsub.s32 0, %v49_v12  ;;  %v54_v15 = vsub.s32 1, %v49_v12 }
  0x46   :  { %631 = vmatpush3.bf16.msra.mxu0 %v630_v47 }
  0x47   :  { %v51_v16 = vrot.slane %v46_v14, %v50_v13  ;;  %v55_v17 = vrot.slane %v46_v14, %v54_v15  ;;  %633 = vmatprep.subr.bf16.mxu0 %v632_v50  ;;  %v237_v55 = vrot.slane %v232_v54, %v50_v13  ;;  %v241_v56 = vrot.slane %v232_v54, %v54_v15 }
  0x48   :  { %591 = vmatpush1.bf16.msra.mxu1 %v590_v22 }
  0x49   :  { %593 = vmatprep.subr.bf16.mxu1 %v592_v23 }
  0x4a   :  { %635 = vmatpush3.bf16.msra.mxu0 %v634_v53 }
  0x4c   :  { %595 = vmatpush1.bf16.msra.mxu1 %v594_v28 }
  0x4d   :  { %597 = vmatprep.subr.bf16.mxu1 %v596_v29 }
  0x50   :  { %599 = vmatpush1.bf16.msra.mxu1 %v598_v32 }
  0x51   :  { %601 = vmatprep.subr.bf16.mxu1 %v600_v35 }
  0x54   :  { %603 = vmatpush1.bf16.msra.mxu1 %v602_v38 }
  0xe8   :  { %v137_v18 = vpop.f32.mrb[0].mxu0 }
  0xe9   :  { %v138_v19 = vadd.f32 %v137_v18, %v51_v16  ;;  %v139_v20 = vpop.f32.mrb[1].mxu0 }
  0xea   :  { %v140_v21 = vadd.f32 %v139_v20, %v55_v17 }
  0xeb   :  { %v160_v24 = vmax.f32 %v138_v19, 0.0 }
  0xec   :  { %v143_v22 = vpop.f32.mrb[2].mxu0  ;;  %v161_v23 = vmax.f32 %v140_v21, 0.0 }
  0xed   :  { %v144_v25 = vadd.f32 %v143_v22, %v51_v16  ;;  %v145_v26 = vpop.f32.mrb[3].mxu0 }
  0xee   :  { %v146_v27 = vadd.f32 %v145_v26, %v55_v17  ;;  %308 = vmatprep.mubr.f32.mxu1 %v161_v23  ;;  %v495_v26 = vld [vmem:[%s869_s6] ss:$0 sm:$0xff] }
  0xef   :  { %309 = vmatmul.mubr.f32.vlgmr.msra.gmra.mrb[0].mxu1 %v160_v24  ;;  %v162_v30 = vmax.f32 %v144_v25, 0.0 }
  0xf0   :  { %v163_v28 = vmax.f32 %v146_v27, 0.0  ;;  %v149_v29 = vpop.f32.mrb[4].mxu0 }
  0xf1   :  { %v150_v31 = vadd.f32 %v149_v29, %v51_v16  ;;  %v151_v32 = vpop.f32.mrb[5].mxu0 }
  0xf2   :  { %v152_v33 = vadd.f32 %v151_v32, %v55_v17  ;;  %314 = vmatprep.mubr.f32.mxu1 %v163_v28 }
  0xf3   :  { %315 = vmatmul.mubr.f32.gmra.mrb[2].mxu1 %v162_v30  ;;  %v164_v36 = vmax.f32 %v150_v31, 0.0 }
  0xf4   :  { %v165_v34 = vmax.f32 %v152_v33, 0.0  ;;  %v155_v35 = vpop.f32.mrb[6].mxu0 }
  0xf5   :  { %v156_v37 = vadd.f32 %v155_v35, %v51_v16  ;;  %v157_v38 = vpop.f32.mrb[7].mxu0 }
  0xf6   :  { %v158_v39 = vadd.f32 %v157_v38, %v55_v17  ;;  %320 = vmatprep.mubr.f32.mxu1 %v165_v34 }
  0xf7   :  { %321 = vmatmul.mubr.f32.gmra.mrb[4].mxu1 %v164_v36  ;;  %v166_v41 = vmax.f32 %v156_v37, 0.0 }
  0xf8   :  { %v167_v40 = vmax.f32 %v158_v39, 0.0 }
  0xfa   :  { %326 = vmatprep.mubr.f32.mxu1 %v167_v40 }
  0xfb   :  { %327 = vmatmul.mubr.f32.gmra.mrb[6].mxu1 %v166_v41 }
 0x1c2   :  { %v310_v57 = vpop.f32.mrb[0].mxu1 }
 0x1c3   :  { %v311_v58 = vadd.f32 %v310_v57, %v237_v55  ;;  %v312_v59 = vpop.f32.mrb[1].mxu1 }
 0x1c4   :  { %v313_v60 = vadd.f32 %v312_v59, %v241_v56 }
 0x1c5   :  { %v341_v61 = vmul.f32 0.01, %v311_v58  ;;  %vm333_vm1 = vcmp.gt.f32.partialorder %v311_v58, 0.0 }
 0x1c6   :  { %v342_v62 = vmul.f32 0.01, %v313_v60  ;;  %v316_v63 = vpop.f32.mrb[2].mxu1  ;;  %vm334_vm2 = vcmp.gt.f32.partialorder %v313_v60, 0.0 }
 0x1c7   :  { %v317_v0 = vadd.f32 %v316_v63, %v237_v55  ;;  %v318_v1 = vpop.f32.mrb[3].mxu1  ;;  %v349_v4 = vsel %vm333_vm1, %v311_v58, %v341_v61 }
 0x1c8   :  { %v319_v2 = vadd.f32 %v318_v1, %v241_v56  ;;  %v350_v3 = vsel %vm334_vm2, %v313_v60, %v342_v62 }
 0x1c9   :  { %v343_v5 = vmul.f32 0.01, %v317_v0  ;;  %460 = vmatprep.mubr.f32.mxu0 %v350_v3  ;;  %vm335_vm4 = vcmp.gt.f32.partialorder %v317_v0, 0.0 }
 0x1ca   :  { %v344_v6 = vmul.f32 0.01, %v319_v2  ;;  %v322_v7 = vpop.f32.mrb[4].mxu1  ;;  %461 = vmatmul.mubr.f32.vlgmr.msra.gmra.mrb[8].mxu0 %v349_v4  ;;  %vm336_vm3 = vcmp.gt.f32.partialorder %v319_v2, 0.0 }
 0x1cb   :  { %v323_v8 = vadd.f32 %v322_v7, %v237_v55  ;;  %v324_v9 = vpop.f32.mrb[5].mxu1  ;;  %v351_v13 = vsel %vm335_vm4, %v317_v0, %v343_v5 }
 0x1cc   :  { %v325_v10 = vadd.f32 %v324_v9, %v241_v56  ;;  %v352_v11 = vsel %vm336_vm3, %v319_v2, %v344_v6 }
 0x1cd   :  { %v345_v12 = vmul.f32 0.01, %v323_v8  ;;  %465 = vmatprep.mubr.f32.mxu0 %v352_v11  ;;  %vm337_vm6 = vcmp.gt.f32.partialorder %v323_v8, 0.0 }
 0x1ce   :  { %v346_v14 = vmul.f32 0.01, %v325_v10  ;;  %v328_v15 = vpop.f32.mrb[6].mxu1  ;;  %466 = vmatmul.mubr.f32.gmra.mrb[10].mxu0 %v351_v13  ;;  %vm338_vm5 = vcmp.gt.f32.partialorder %v325_v10, 0.0 }
 0x1cf   :  { %v329_v16 = vadd.f32 %v328_v15, %v237_v55  ;;  %v330_v17 = vpop.f32.mrb[7].mxu1  ;;  %v353_v21 = vsel %vm337_vm6, %v323_v8, %v345_v12 }
 0x1d0   :  { %v331_v18 = vadd.f32 %v330_v17, %v241_v56  ;;  %v354_v19 = vsel %vm338_vm5, %v325_v10, %v346_v14 }
 0x1d1   :  { %v347_v20 = vmul.f32 0.01, %v329_v16  ;;  %470 = vmatprep.mubr.f32.mxu0 %v354_v19  ;;  %vm339_vm8 = vcmp.gt.f32.partialorder %v329_v16, 0.0 }
 0x1d2   :  { %v348_v22 = vmul.f32 0.01, %v331_v18  ;;  %471 = vmatmul.mubr.f32.gmra.mrb[12].mxu0 %v353_v21  ;;  %vm340_vm7 = vcmp.gt.f32.partialorder %v331_v18, 0.0 }
 0x1d3   :  { %v355_v24 = vsel %vm339_vm8, %v329_v16, %v347_v20 }
 0x1d4   :  { %v356_v23 = vsel %vm340_vm7, %v331_v18, %v348_v22 }
 0x1d5   :  { %475 = vmatprep.mubr.f32.mxu0 %v356_v23 }
 0x1d6   :  { %476 = vmatmul.mubr.f32.gmra.mrb[14].mxu0 %v355_v24 }
 0x29d   :  { %v528_v25 = vpop.f32.mrb[8].mxu0 }
 0x29e   :  { %v529_v27 = vpop.f32.mrb[9].mxu0 }
 0x29f   :  { %v530_v28 = vadd.f32 %v529_v27, %v528_v25 }
 0x2a1   :  { %v463_v29 = vadd.f32 %v530_v28, %v495_v26  ;;  %v531_v30 = vpop.f32.mrb[10].mxu0 }
 0x2a2   :  { %v532_v31 = vpop.f32.mrb[11].mxu0 }
 0x2a3   :  { %482 = vst.msk [vmem:[%s870_s7] sm:$0xff] %vm481_vm9, %v463_v29  ;;  %v533_v32 = vadd.f32 %v532_v31, %v531_v30 }
 0x2a5   :  { %v468_v33 = vadd.f32 %v533_v32, %v495_v26  ;;  %v534_v34 = vpop.f32.mrb[12].mxu0 }
 0x2a6   :  { %v535_v35 = vpop.f32.mrb[13].mxu0 }
 0x2a7   :  { %483 = vst.msk [vmem:[%s870_s7 + $0x8] sm:$0xff] %vm481_vm9, %v468_v33  ;;  %v536_v36 = vadd.f32 %v535_v35, %v534_v34 }
 0x2a9   :  { %v473_v37 = vadd.f32 %v536_v36, %v495_v26  ;;  %v537_v38 = vpop.f32.mrb[14].mxu0 }
 0x2aa   :  { %v538_v39 = vpop.f32.mrb[15].mxu0 }
 0x2ab   :  { %484 = vst.msk [vmem:[%s870_s7 + $0x10] sm:$0xff] %vm481_vm9, %v473_v37  ;;  %v539_v40 = vadd.f32 %v538_v39, %v537_v38 }
 0x2ad   :  { %v478_v41 = vadd.f32 %v539_v40, %v495_v26 }
 0x2af   :  { %485 = vst.msk [vmem:[%s870_s7 + $0x18] sm:$0xff] %vm481_vm9, %v478_v41 }
 0x2b0   :  { %490 = vsyncpa [#allocation3], 1 }

</bundles_post_ra>
